<compile_context>
chip_gen: v6e
topology: v6e:2x2x1
jax: 0.10.0
libtpu: 0.0.40
codegen_flags: <defaults>
</compile_context>

<pallas_src>
import functools

import jax
import jax.numpy as jnp
from jax.experimental import pallas as pl
from jax.experimental.pallas import tpu as pltpu

LANE = 128


def _attention_block_kernel(xq_ref, xk_ref,
                            wq_ref, bq_ref, wk_ref, bk_ref, wv_ref, bv_ref,
                            wo_ref, bo_ref,
                            o_ref,
                            q_sc, m_sc, l_sc, acc_sc):
    ki = pl.program_id(1)

    @pl.when(ki == 0)
    def _init():
        # Project the query tile once per query tile; reset online-softmax state.
        q = jnp.dot(xq_ref[...], wq_ref[...], preferred_element_type=jnp.float32)
        q_sc[...] = q + bq_ref[...]
        m_sc[...] = jnp.full_like(m_sc, -jnp.inf)
        l_sc[...] = jnp.zeros_like(l_sc)
        acc_sc[...] = jnp.zeros_like(acc_sc)

    # K / V projections for the current key tile (weights are VMEM-resident).
    xk = xk_ref[...]
    k = jnp.dot(xk, wk_ref[...], preferred_element_type=jnp.float32) + bk_ref[...]
    v = jnp.dot(xk, wv_ref[...], preferred_element_type=jnp.float32) + bv_ref[...]

    # Online softmax over the key axis (dim=1 of the [N, N] score matrix).
    s = jnp.dot(q_sc[...], k.T, preferred_element_type=jnp.float32)      # [TQ, TK]
    m_new = jnp.maximum(m_sc[...], s.max(axis=-1, keepdims=True))
    alpha = jnp.exp(m_sc[...] - m_new)
    p = jnp.exp(s - m_new)
    l_sc[...] = alpha * l_sc[...] + p.sum(axis=-1, keepdims=True)
    acc_sc[...] = alpha * acc_sc[...] + jnp.dot(p, v, preferred_element_type=jnp.float32)
    m_sc[...] = m_new

    @pl.when(ki == pl.num_programs(1) - 1)
    def _finalize():
        weighted = acc_sc[...] / l_sc[...]                               # attn @ v
        y = jnp.dot(weighted, wo_ref[...], preferred_element_type=jnp.float32)
        o_ref[...] = (y + bo_ref[...]).astype(o_ref.dtype)


def _pad2(a, rows, cols):
    return jnp.pad(a, ((0, rows - a.shape[0]), (0, cols - a.shape[1])))


def _round_up(n, m):
    return pl.cdiv(n, m) * m


@functools.partial(jax.jit, static_argnames=("tile_q", "tile_k"))
def attention_block_forward(x, wq, bq, wk, bk, wv, bv, wo, bo, *,
                            tile_q=16, tile_k=16):
    """x: [N, hidden]; w*: PyTorch nn.Linear layout [out, in]; b*: [out]."""
    n_tokens, hidden = x.shape
    key_size = wq.shape[0]

    if n_tokens % tile_q or n_tokens % tile_k:
        # TODO(synk): mask padded key rows (score = -inf) to support ragged token counts.
        raise ValueError("n_tokens must be divisible by tile_q and tile_k")

    hp = _round_up(hidden, LANE)      # lane-dense feature dims
    kp = _round_up(key_size, LANE)

    # Zero-pad features to 128 lanes; padded weight/bias columns are zero so
    # padded output columns stay exactly zero and are sliced off below.
    x_p = _pad2(x, n_tokens, hp)
    wq_p = _pad2(wq.T, hp, kp)        # [hidden, key_size] -> [hp, kp]
    wk_p = _pad2(wk.T, hp, kp)
    wv_p = _pad2(wv.T, hp, kp)
    wo_p = _pad2(wo.T, kp, hp)        # [key_size, hidden] -> [kp, hp]
    bq_p = _pad2(bq.reshape(1, -1), 1, kp)
    bk_p = _pad2(bk.reshape(1, -1), 1, kp)
    bv_p = _pad2(bv.reshape(1, -1), 1, kp)
    bo_p = _pad2(bo.reshape(1, -1), 1, hp)

    grid = (n_tokens // tile_q, n_tokens // tile_k)

    def const(shape):
        return pl.BlockSpec(shape, lambda qi, ki: (0, 0))

    out = pl.pallas_call(
        _attention_block_kernel,
        out_shape=jax.ShapeDtypeStruct((n_tokens, hp), x.dtype),
        grid_spec=pltpu.PrefetchScalarGridSpec(
            num_scalar_prefetch=0,
            grid=grid,
            in_specs=[
                pl.BlockSpec((tile_q, hp), lambda qi, ki: (qi, 0)),  # x rows for Q
                pl.BlockSpec((tile_k, hp), lambda qi, ki: (ki, 0)),  # x rows for K/V
                const((hp, kp)), const((1, kp)),                     # Wq, bq
                const((hp, kp)), const((1, kp)),                     # Wk, bk
                const((hp, kp)), const((1, kp)),                     # Wv, bv
                const((kp, hp)), const((1, hp)),                     # Wo, bo
            ],
            out_specs=pl.BlockSpec((tile_q, hp), lambda qi, ki: (qi, 0)),
            scratch_shapes=[
                pltpu.VMEM((tile_q, kp), jnp.float32),   # projected q tile
                pltpu.VMEM((tile_q, 1), jnp.float32),    # running max
                pltpu.VMEM((tile_q, 1), jnp.float32),    # running denominator
                pltpu.VMEM((tile_q, kp), jnp.float32),   # running numerator
            ],
        ),
        compiler_params=pltpu.CompilerParams(
            dimension_semantics=("parallel", "arbitrary"),
        ),
    )(x_p, x_p, wq_p, bq_p, wk_p, bk_p, wv_p, bv_p, wo_p, bo_p)

    return out[:, :hidden]


if __name__ == "__main__":
    # model_config: hidden_size=32, key_size=64; x has 64 token rows.
    hidden_size = 32
    key_size = 64
    n_tokens = 64

    root = jax.random.PRNGKey(0)
    kx, kwq, kbq, kwk, kbk, kwv, kbv, kwo, kbo = jax.random.split(root, 9)

    x = jax.random.normal(kx, (n_tokens, hidden_size), dtype=jnp.float32)
    # PyTorch nn.Linear layout: weight [out, in], bias [out].
    wq = jax.random.normal(kwq, (key_size, hidden_size), jnp.float32) * 0.1
    bq = jax.random.normal(kbq, (key_size,), jnp.float32) * 0.1
    wk = jax.random.normal(kwk, (key_size, hidden_size), jnp.float32) * 0.1
    bk = jax.random.normal(kbk, (key_size,), jnp.float32) * 0.1
    wv = jax.random.normal(kwv, (key_size, hidden_size), jnp.float32) * 0.1
    bv = jax.random.normal(kbv, (key_size,), jnp.float32) * 0.1
    wo = jax.random.normal(kwo, (hidden_size, key_size), jnp.float32) * 0.1
    bo = jax.random.normal(kbo, (hidden_size,), jnp.float32) * 0.1

    out = attention_block_forward(x, wq, bq, wk, bk, wv, bv, wo, bo)
    jax.block_until_ready(out)

    # Reference: plain JAX mirror of the PyTorch forward.
    q = x @ wq.T + bq
    k = x @ wk.T + bk
    v = x @ wv.T + bv
    attn = jax.nn.softmax(q @ k.T, axis=1)
    ref = (attn @ v) @ wo.T + bo

    assert out.shape == (n_tokens, hidden_size)
    # f32 matmuls run as bf16 MXU passes -> bf16-level tolerance.
    assert jnp.allclose(out, ref, atol=2e-2, rtol=2e-2), float(jnp.max(jnp.abs(out - ref)))
    print("KERNEL_OK")
</pallas_src>

<mosaic_0001>
module attributes {stable_mosaic.version = 11 : i64} {
  func.func @_attention_block_kernel(%arg0: i32, %arg1: i32, %arg2: memref<16x128xf32, #tpu.memory_space<vmem>>, %arg3: memref<16x128xf32, #tpu.memory_space<vmem>>, %arg4: memref<128x128xf32, #tpu.memory_space<vmem>>, %arg5: memref<1x128xf32, #tpu.memory_space<vmem>>, %arg6: memref<128x128xf32, #tpu.memory_space<vmem>>, %arg7: memref<1x128xf32, #tpu.memory_space<vmem>>, %arg8: memref<128x128xf32, #tpu.memory_space<vmem>>, %arg9: memref<1x128xf32, #tpu.memory_space<vmem>>, %arg10: memref<128x128xf32, #tpu.memory_space<vmem>>, %arg11: memref<1x128xf32, #tpu.memory_space<vmem>>, %arg12: memref<16x128xf32, #tpu.memory_space<vmem>>, %arg13: memref<16x128xf32, #tpu.memory_space<vmem>>, %arg14: memref<16x1xf32, #tpu.memory_space<vmem>>, %arg15: memref<16x1xf32, #tpu.memory_space<vmem>>, %arg16: memref<16x128xf32, #tpu.memory_space<vmem>>) attributes {dimension_semantics = [#tpu.dimension_semantics<parallel>, #tpu.dimension_semantics<arbitrary>], iteration_bounds = array<i64: 4, 4>, scalar_prefetch = 0 : i64, scratch_operands = 4 : i64, tpu.core_type = #tpu.core_type<tc>, window_params = [{transform_indices = @transform_0, window_bounds = array<i64: 16, 128>}, {transform_indices = @transform_1, window_bounds = array<i64: 16, 128>}, {pipeline_mode = #tpu.pipeline_mode<synchronous>, transform_indices = @transform_2, window_bounds = array<i64: 128, 128>}, {pipeline_mode = #tpu.pipeline_mode<synchronous>, transform_indices = @transform_3, window_bounds = array<i64: 1, 128>}, {pipeline_mode = #tpu.pipeline_mode<synchronous>, transform_indices = @transform_4, window_bounds = array<i64: 128, 128>}, {pipeline_mode = #tpu.pipeline_mode<synchronous>, transform_indices = @transform_5, window_bounds = array<i64: 1, 128>}, {pipeline_mode = #tpu.pipeline_mode<synchronous>, transform_indices = @transform_6, window_bounds = array<i64: 128, 128>}, {pipeline_mode = #tpu.pipeline_mode<synchronous>, transform_indices = @transform_7, window_bounds = array<i64: 1, 128>}, {pipeline_mode = #tpu.pipeline_mode<synchronous>, transform_indices = @transform_8, window_bounds = array<i64: 128, 128>}, {pipeline_mode = #tpu.pipeline_mode<synchronous>, transform_indices = @transform_9, window_bounds = array<i64: 1, 128>}, {transform_indices = @transform_10, window_bounds = array<i64: 16, 128>}]} {
    %c0_i32 = arith.constant 0 : i32
    %0 = arith.cmpi eq, %arg1, %c0_i32 : i32
    %1 = arith.extui %0 : i1 to i32
    %c0_i32_0 = arith.constant 0 : i32
    %2 = arith.cmpi ne, %1, %c0_i32_0 : i32
    scf.if %2 {
      %c0_32 = arith.constant 0 : index
      %c0_33 = arith.constant 0 : index
      %43 = vector.load %arg2[%c0_32, %c0_33] : memref<16x128xf32, #tpu.memory_space<vmem>>, vector<16x128xf32>
      %c0_34 = arith.constant 0 : index
      %c0_35 = arith.constant 0 : index
      %44 = vector.load %arg4[%c0_34, %c0_35] : memref<128x128xf32, #tpu.memory_space<vmem>>, vector<128x128xf32>
      %cst_36 = arith.constant dense<0.000000e+00> : vector<16x128xf32>
      %45 = tpu.matmul %43, %44, %cst_36 {dimension_numbers = #tpu.dot_dimension_numbers<[1], [0], [0], [1], [0, 0, 1, 1], [], []>} : vector<16x128xf32>, vector<128x128xf32>, vector<16x128xf32> -> vector<16x128xf32>
      %c0_37 = arith.constant 0 : index
      %c0_38 = arith.constant 0 : index
      %46 = vector.load %arg5[%c0_37, %c0_38] : memref<1x128xf32, #tpu.memory_space<vmem>>, vector<1x128xf32>
      %47 = vector.broadcast %46 : vector<1x128xf32> to vector<16x128xf32>
      %48 = arith.addf %45, %47 : vector<16x128xf32>
      %c0_39 = arith.constant 0 : index
      %c0_40 = arith.constant 0 : index
      %49 = vector.load %arg13[%c0_39, %c0_40] : memref<16x128xf32, #tpu.memory_space<vmem>>, vector<16x128xf32>
      tpu.vector_store %arg13[%c0_39, %c0_40], %48 {strides = array<i32>} : memref<16x128xf32, #tpu.memory_space<vmem>>, vector<16x128xf32>,
      %cst_41 = arith.constant 0xFF800000 : f32
      %50 = vector.broadcast %cst_41 : f32 to vector<16x1xf32>
      %c0_42 = arith.constant 0 : index
      %c0_43 = arith.constant 0 : index
      %51 = vector.load %arg14[%c0_42, %c0_43] : memref<16x1xf32, #tpu.memory_space<vmem>>, vector<16x1xf32>
      tpu.vector_store %arg14[%c0_42, %c0_43], %50 {strides = array<i32>} : memref<16x1xf32, #tpu.memory_space<vmem>>, vector<16x1xf32>,
      %cst_44 = arith.constant 0.000000e+00 : f32
      %52 = vector.broadcast %cst_44 : f32 to vector<16x1xf32>
      %c0_45 = arith.constant 0 : index
      %c0_46 = arith.constant 0 : index
      %53 = vector.load %arg15[%c0_45, %c0_46] : memref<16x1xf32, #tpu.memory_space<vmem>>, vector<16x1xf32>
      tpu.vector_store %arg15[%c0_45, %c0_46], %52 {strides = array<i32>} : memref<16x1xf32, #tpu.memory_space<vmem>>, vector<16x1xf32>,
      %cst_47 = arith.constant 0.000000e+00 : f32
      %54 = vector.broadcast %cst_47 : f32 to vector<16x128xf32>
      %c0_48 = arith.constant 0 : index
      %c0_49 = arith.constant 0 : index
      %55 = vector.load %arg16[%c0_48, %c0_49] : memref<16x128xf32, #tpu.memory_space<vmem>>, vector<16x128xf32>
      tpu.vector_store %arg16[%c0_48, %c0_49], %54 {strides = array<i32>} : memref<16x128xf32, #tpu.memory_space<vmem>>, vector<16x128xf32>,
    } else {
    }
    %c0 = arith.constant 0 : index
    %c0_1 = arith.constant 0 : index
    %3 = vector.load %arg3[%c0, %c0_1] : memref<16x128xf32, #tpu.memory_space<vmem>>, vector<16x128xf32>
    %c0_2 = arith.constant 0 : index
    %c0_3 = arith.constant 0 : index
    %4 = vector.load %arg6[%c0_2, %c0_3] : memref<128x128xf32, #tpu.memory_space<vmem>>, vector<128x128xf32>
    %cst = arith.constant dense<0.000000e+00> : vector<16x128xf32>
    %5 = tpu.matmul %3, %4, %cst {dimension_numbers = #tpu.dot_dimension_numbers<[1], [0], [0], [1], [0, 0, 1, 1], [], []>} : vector<16x128xf32>, vector<128x128xf32>, vector<16x128xf32> -> vector<16x128xf32>
    %c0_4 = arith.constant 0 : index
    %c0_5 = arith.constant 0 : index
    %6 = vector.load %arg7[%c0_4, %c0_5] : memref<1x128xf32, #tpu.memory_space<vmem>>, vector<1x128xf32>
    %7 = vector.broadcast %6 : vector<1x128xf32> to vector<16x128xf32>
    %8 = arith.addf %5, %7 : vector<16x128xf32>
    %c0_6 = arith.constant 0 : index
    %c0_7 = arith.constant 0 : index
    %9 = vector.load %arg8[%c0_6, %c0_7] : memref<128x128xf32, #tpu.memory_space<vmem>>, vector<128x128xf32>
    %cst_8 = arith.constant dense<0.000000e+00> : vector<16x128xf32>
    %10 = tpu.matmul %3, %9, %cst_8 {dimension_numbers = #tpu.dot_dimension_numbers<[1], [0], [0], [1], [0, 0, 1, 1], [], []>} : vector<16x128xf32>, vector<128x128xf32>, vector<16x128xf32> -> vector<16x128xf32>
    %c0_9 = arith.constant 0 : index
    %c0_10 = arith.constant 0 : index
    %11 = vector.load %arg9[%c0_9, %c0_10] : memref<1x128xf32, #tpu.memory_space<vmem>>, vector<1x128xf32>
    %12 = vector.broadcast %11 : vector<1x128xf32> to vector<16x128xf32>
    %13 = arith.addf %10, %12 : vector<16x128xf32>
    %c0_11 = arith.constant 0 : index
    %c0_12 = arith.constant 0 : index
    %14 = vector.load %arg13[%c0_11, %c0_12] : memref<16x128xf32, #tpu.memory_space<vmem>>, vector<16x128xf32>
    %15 = tpu.transpose %8, [1, 0] : vector<16x128xf32> -> vector<128x16xf32>
    %cst_13 = arith.constant dense<0.000000e+00> : vector<16x16xf32>
    %16 = tpu.matmul %14, %15, %cst_13 {dimension_numbers = #tpu.dot_dimension_numbers<[1], [0], [0], [1], [0, 0, 1, 1], [], []>} : vector<16x128xf32>, vector<128x16xf32>, vector<16x16xf32> -> vector<16x16xf32>
    %c0_14 = arith.constant 0 : index
    %c0_15 = arith.constant 0 : index
    %17 = vector.load %arg14[%c0_14, %c0_15] : memref<16x1xf32, #tpu.memory_space<vmem>>, vector<16x1xf32>
    %cst_16 = arith.constant dense<0xFF800000> : vector<16xf32>
    %18 = vector.multi_reduction <maximumf>, %16, %cst_16 [1] : vector<16x16xf32> to vector<16xf32>
    %19 = vector.shape_cast %18 : vector<16xf32> to vector<16x1xf32>
    %20 = arith.maximumf %17, %19 : vector<16x1xf32>
    %c0_17 = arith.constant 0 : index
    %c0_18 = arith.constant 0 : index
    %21 = vector.load %arg14[%c0_17, %c0_18] : memref<16x1xf32, #tpu.memory_space<vmem>>, vector<16x1xf32>
    %22 = arith.subf %21, %20 : vector<16x1xf32>
    %23 = math.exp %22 : vector<16x1xf32>
    %24 = vector.broadcast %20 : vector<16x1xf32> to vector<16x16xf32>
    %25 = arith.subf %16, %24 : vector<16x16xf32>
    %26 = math.exp %25 : vector<16x16xf32>
    %c0_19 = arith.constant 0 : index
    %c0_20 = arith.constant 0 : index
    %27 = vector.load %arg15[%c0_19, %c0_20] : memref<16x1xf32, #tpu.memory_space<vmem>>, vector<16x1xf32>
    %28 = arith.mulf %23, %27 : vector<16x1xf32>
    %cst_21 = arith.constant dense<0.000000e+00> : vector<16xf32>
    %29 = vector.multi_reduction <add>, %26, %cst_21 [1] : vector<16x16xf32> to vector<16xf32>
    %30 = vector.shape_cast %29 : vector<16xf32> to vector<16x1xf32>
    %31 = arith.addf %28, %30 : vector<16x1xf32>
    %c0_22 = arith.constant 0 : index
    %c0_23 = arith.constant 0 : index
    %32 = vector.load %arg15[%c0_22, %c0_23] : memref<16x1xf32, #tpu.memory_space<vmem>>, vector<16x1xf32>
    tpu.vector_store %arg15[%c0_22, %c0_23], %31 {strides = array<i32>} : memref<16x1xf32, #tpu.memory_space<vmem>>, vector<16x1xf32>,
    %c0_24 = arith.constant 0 : index
    %c0_25 = arith.constant 0 : index
    %33 = vector.load %arg16[%c0_24, %c0_25] : memref<16x128xf32, #tpu.memory_space<vmem>>, vector<16x128xf32>
    %34 = vector.broadcast %23 : vector<16x1xf32> to vector<16x128xf32>
    %35 = arith.mulf %34, %33 : vector<16x128xf32>
    %cst_26 = arith.constant dense<0.000000e+00> : vector<16x128xf32>
    %36 = tpu.matmul %26, %13, %cst_26 {dimension_numbers = #tpu.dot_dimension_numbers<[1], [0], [0], [1], [0, 0, 1, 1], [], []>} : vector<16x16xf32>, vector<16x128xf32>, vector<16x128xf32> -> vector<16x128xf32>
    %37 = arith.addf %35, %36 : vector<16x128xf32>
    %c0_27 = arith.constant 0 : index
    %c0_28 = arith.constant 0 : index
    %38 = vector.load %arg16[%c0_27, %c0_28] : memref<16x128xf32, #tpu.memory_space<vmem>>, vector<16x128xf32>
    tpu.vector_store %arg16[%c0_27, %c0_28], %37 {strides = array<i32>} : memref<16x128xf32, #tpu.memory_space<vmem>>, vector<16x128xf32>,
    %c0_29 = arith.constant 0 : index
    %c0_30 = arith.constant 0 : index
    %39 = vector.load %arg14[%c0_29, %c0_30] : memref<16x1xf32, #tpu.memory_space<vmem>>, vector<16x1xf32>
    tpu.vector_store %arg14[%c0_29, %c0_30], %20 {strides = array<i32>} : memref<16x1xf32, #tpu.memory_space<vmem>>, vector<16x1xf32>,
    %c3_i32 = arith.constant 3 : i32
    %40 = arith.cmpi eq, %arg1, %c3_i32 : i32
    %41 = arith.extui %40 : i1 to i32
    %c0_i32_31 = arith.constant 0 : i32
    %42 = arith.cmpi ne, %41, %c0_i32_31 : i32
    scf.if %42 {
      %c0_32 = arith.constant 0 : index
      %c0_33 = arith.constant 0 : index
      %43 = vector.load %arg16[%c0_32, %c0_33] : memref<16x128xf32, #tpu.memory_space<vmem>>, vector<16x128xf32>
      %c0_34 = arith.constant 0 : index
      %c0_35 = arith.constant 0 : index
      %44 = vector.load %arg15[%c0_34, %c0_35] : memref<16x1xf32, #tpu.memory_space<vmem>>, vector<16x1xf32>
      %45 = vector.broadcast %44 : vector<16x1xf32> to vector<16x128xf32>
      %46 = arith.divf %43, %45 : vector<16x128xf32>
      %c0_36 = arith.constant 0 : index
      %c0_37 = arith.constant 0 : index
      %47 = vector.load %arg10[%c0_36, %c0_37] : memref<128x128xf32, #tpu.memory_space<vmem>>, vector<128x128xf32>
      %cst_38 = arith.constant dense<0.000000e+00> : vector<16x128xf32>
      %48 = tpu.matmul %46, %47, %cst_38 {dimension_numbers = #tpu.dot_dimension_numbers<[1], [0], [0], [1], [0, 0, 1, 1], [], []>} : vector<16x128xf32>, vector<128x128xf32>, vector<16x128xf32> -> vector<16x128xf32>
      %c0_39 = arith.constant 0 : index
      %c0_40 = arith.constant 0 : index
      %49 = vector.load %arg11[%c0_39, %c0_40] : memref<1x128xf32, #tpu.memory_space<vmem>>, vector<1x128xf32>
      %50 = vector.broadcast %49 : vector<1x128xf32> to vector<16x128xf32>
      %51 = arith.addf %48, %50 : vector<16x128xf32>
      %c0_41 = arith.constant 0 : index
      %c0_42 = arith.constant 0 : index
      %52 = vector.load %arg12[%c0_41, %c0_42] : memref<16x128xf32, #tpu.memory_space<vmem>>, vector<16x128xf32>
      tpu.vector_store %arg12[%c0_41, %c0_42], %51 {strides = array<i32>} : memref<16x128xf32, #tpu.memory_space<vmem>>, vector<16x128xf32>,
    } else {
    }
    return
  }
  func.func @transform_0(%arg0: i32, %arg1: i32) -> (i32, i32) {
    %c0_i32 = arith.constant 0 : i32
    %c0_i32_0 = arith.constant 0 : i32
    return %arg0, %c0_i32 : i32, i32
  }
  func.func @transform_1(%arg0: i32, %arg1: i32) -> (i32, i32) {
    %c0_i32 = arith.constant 0 : i32
    %c0_i32_0 = arith.constant 0 : i32
    return %arg1, %c0_i32 : i32, i32
  }
  func.func @transform_2(%arg0: i32, %arg1: i32) -> (i32, i32) {
    %c0_i32 = arith.constant 0 : i32
    %c0_i32_0 = arith.constant 0 : i32
    %c0_i32_1 = arith.constant 0 : i32
    return %c0_i32, %c0_i32_0 : i32, i32
  }
  func.func @transform_3(%arg0: i32, %arg1: i32) -> (i32, i32) {
    %c0_i32 = arith.constant 0 : i32
    %c0_i32_0 = arith.constant 0 : i32
    %c0_i32_1 = arith.constant 0 : i32
    return %c0_i32, %c0_i32_0 : i32, i32
  }
  func.func @transform_4(%arg0: i32, %arg1: i32) -> (i32, i32) {
    %c0_i32 = arith.constant 0 : i32
    %c0_i32_0 = arith.constant 0 : i32
    %c0_i32_1 = arith.constant 0 : i32
    return %c0_i32, %c0_i32_0 : i32, i32
  }
  func.func @transform_5(%arg0: i32, %arg1: i32) -> (i32, i32) {
    %c0_i32 = arith.constant 0 : i32
    %c0_i32_0 = arith.constant 0 : i32
    %c0_i32_1 = arith.constant 0 : i32
    return %c0_i32, %c0_i32_0 : i32, i32
  }
  func.func @transform_6(%arg0: i32, %arg1: i32) -> (i32, i32) {
    %c0_i32 = arith.constant 0 : i32
    %c0_i32_0 = arith.constant 0 : i32
    %c0_i32_1 = arith.constant 0 : i32
    return %c0_i32, %c0_i32_0 : i32, i32
  }
  func.func @transform_7(%arg0: i32, %arg1: i32) -> (i32, i32) {
    %c0_i32 = arith.constant 0 : i32
    %c0_i32_0 = arith.constant 0 : i32
    %c0_i32_1 = arith.constant 0 : i32
    return %c0_i32, %c0_i32_0 : i32, i32
  }
  func.func @transform_8(%arg0: i32, %arg1: i32) -> (i32, i32) {
    %c0_i32 = arith.constant 0 : i32
    %c0_i32_0 = arith.constant 0 : i32
    %c0_i32_1 = arith.constant 0 : i32
    return %c0_i32, %c0_i32_0 : i32, i32
  }
  func.func @transform_9(%arg0: i32, %arg1: i32) -> (i32, i32) {
    %c0_i32 = arith.constant 0 : i32
    %c0_i32_0 = arith.constant 0 : i32
    %c0_i32_1 = arith.constant 0 : i32
    return %c0_i32, %c0_i32_0 : i32, i32
  }
  func.func @transform_10(%arg0: i32, %arg1: i32) -> (i32, i32) {
    %c0_i32 = arith.constant 0 : i32
    %c0_i32_0 = arith.constant 0 : i32
    return %arg0, %c0_i32 : i32, i32
  }
}

</mosaic_0001>

<bundles_post_ra>
// kernel: attention_block_forward.1
= control target key start
LH: loop header
LB: loop body
LE: loop exit
PB: predicated region body
PF: predicated region fallthrough
CT: control target
= control target key end

     0   :  { %s1549_s13 = smov 0   ;;  %s1551_s14 = smov 0   ;;  %s1838_s0 = inlined_call_operand.vmem [shape: f32[64,128], index: 0, kind: input, shape index: {}, may-alias: {0,1}]   ;;  %s1839_s1 = inlined_call_operand.vmem [shape: f32[64,128], index: 1, kind: input, shape index: {}, may-alias: {0,1}]   ;;  %s1840_s2 = inlined_call_operand.vmem [shape: f32[128,128], index: 2, kind: input, shape index: {}]   ;;  %s1841_s3 = inlined_call_operand.vmem [shape: f32[1,128], index: 3, kind: input, shape index: {}]   ;;  %s1842_s4 = inlined_call_operand.vmem [shape: f32[128,128], index: 4, kind: input, shape index: {}]   ;;  %s1843_s5 = inlined_call_operand.vmem [shape: f32[1,128], index: 5, kind: input, shape index: {}]   ;;  %s1844_s6 = inlined_call_operand.vmem [shape: f32[128,128], index: 6, kind: input, shape index: {}]   ;;  %s1845_s7 = inlined_call_operand.vmem [shape: f32[1,128], index: 7, kind: input, shape index: {}]   ;;  %s1846_s8 = inlined_call_operand.vmem [shape: f32[128,128], index: 8, kind: input, shape index: {}]   ;;  %s1847_s9 = inlined_call_operand.vmem [shape: f32[1,128], index: 9, kind: input, shape index: {}]   ;;  %s1848_s10 = inlined_call_operand.vmem [shape: f32[64,128], index: 10, kind: output, shape index: {}]  }
   0x1   :  { %s1553_s15 = smov 0   ;;  %s1555_s16 = smov 0  }
   0x2   :  { %s1557_s17 = smov 0  }
   0x3 LB: > { %s29_s18 = sadd.s32 1, %s1480_s15  ;;  %s32_s19 = sadd.s32 1, %s1484_s16  ;;  %s1488_s17 = sphi %s1557_s17, %s20_s17   ;;  %s1484_s16 = sphi %s1555_s16, %s1852_s16   ;;  %s1480_s15 = sphi %s1553_s15, %s1851_s15   ;;  %s1476_s14 = sphi %s1551_s14, %s1850_s14   ;;  %s1472_s13 = sphi %s1549_s13, %s1849_s13  }
   0x4   : > { %p30_p0 = scmp.ge.s32.totalorder %s29_s18, 4  ;;  %p1140_p1 = scmp.ge.s32.totalorder %s1488_s17, 1 }
   0x5   : > { %p336_p2 = scmp.lt.s32.totalorder %s1488_s17, 17 }
   0x6   : > { %s1854_s18 = smov (%p30_p0, %s29_s18), 0  ;;  %s1856_s19 = smov (!%p30_p0, %s32_s19), %s1484_s16 }
   0x7   : > { %p337_p3 = pnand %p1140_p1, %p336_p2  ;;  %p34_p4 = scmp.ge.s32.totalorder %s1856_s19, 4 }
   0x8   : > { %s1141_s20 = sshll.u32 (!%p337_p3), %s1476_s14, 1  ;;  %s1143_s21 = sshll.u32 (!%p337_p3), %s1472_s13, 1 }
   0x9   : > { %s1858_s19 = smov (%p34_p4, %s1856_s19), 0  ;;  %340 = sbr.rel (%p337_p3) target bundleno = 1513 (0x5e9), region = 60 }
   0xa   : > { %p380_p5 = scmp.lt.s32.totalorder (!%p337_p3), %s1141_s20, 7  ;;  %p386_p6 = scmp.lt.s32.totalorder (!%p337_p3), %s1143_s21, 7 }
   0xb   : > { %p1147_p7 = scmp.ne.s32.totalorder (!%p337_p3), %s1472_s13, 0 }
   0xe   : > { %s1860_s20 = smov (!%p380_p5, %s1141_s20), 7  ;;  %s1862_s21 = smov (!%p386_p6, %s1143_s21), 7 }
   0xf   : > { %s1142_s22 = sshll.u32 %s1860_s20, 3  ;;  %s1144_s26 = sshll.u32 %s1862_s21, 3 }
  0x10   : > { %s1585_s25 = scalar_lea.vmem %s1838_s0, %s1142_s22  ;;  %s1590_s29 = scalar_lea.vmem %s1839_s1, %s1144_s26 }
  0x11   : > { %s1595_s12 = scalar_lea.vmem %s1848_s10, %s1142_s22  ;;  %400 = sbr.rel (%p1147_p7) target bundleno = 253 (0xfd), region = 64 }
  0x16   : > { %v418_v0 = vld [vmem:[%s1840_s2 + $0x78] sm:$0xff]  ;;  %v417_v1 = vld [vmem:[%s1840_s2 + $0x70] sm:$0xff]  ;;  %v416_v2 = vld [vmem:[%s1840_s2 + $0x68] sm:$0xff]  ;;  %vm503_vm0 = vcmask 7168   ;;  %v1490_v18 = vmov -inf   ;;  %v1491_v19 = vmov 0.0  }
  0x17   : > { %1237 = vmatprep.subr.mxu0 %v418_v0  ;;  %v415_v3 = vld [vmem:[%s1840_s2 + $0x60] sm:$0xff]  ;;  %v414_v5 = vld [vmem:[%s1840_s2 + $0x58] sm:$0xff]  ;;  %v413_v6 = vld [vmem:[%s1840_s2 + $0x50] sm:$0xff]  ;;  %504 = vst.msk [vmem:[#allocation3] sm:$0xff] %vm503_vm0, %v1490_v18 }
  0x18   : > { %1238 = vmatpush3.msra.mxu0 %v418_v0  ;;  %v401_v4 = vld [vmem:[%s1585_s25] sm:$0xff]  ;;  %v412_v7 = vld [vmem:[%s1840_s2 + $0x48] sm:$0xff]  ;;  %v410_v9 = vld [vmem:[%s1840_s2 + $0x38] sm:$0xff]  ;;  %505 = vst.msk [vmem:[#allocation3 + $0x8] sm:$0xff] %vm503_vm0, %v1490_v18 }
  0x19   : > { %1239 = vmatprep.subr.mxu0 %v417_v1  ;;  %1269 = vmatprep.mubr.f32.mxu0 %v401_v4  ;;  %v411_v8 = vld [vmem:[%s1840_s2 + $0x40] sm:$0xff]  ;;  %v409_v10 = vld [vmem:[%s1840_s2 + $0x30] sm:$0xff]  ;;  %v408_v11 = vld [vmem:[%s1840_s2 + $0x28] sm:$0xff]  ;;  %506 = vst.msk [vmem:[#allocation4] sm:$0xff] %vm503_vm0, %v1491_v19 }
  0x1a   : > { %1240 = vmatpush3.msra.mxu0 %v417_v1  ;;  %v407_v12 = vld [vmem:[%s1840_s2 + $0x20] sm:$0xff]  ;;  %v406_v13 = vld [vmem:[%s1840_s2 + $0x18] sm:$0xff]  ;;  %v405_v14 = vld [vmem:[%s1840_s2 + $0x10] sm:$0xff]  ;;  %507 = vst.msk [vmem:[#allocation4 + $0x8] sm:$0xff] %vm503_vm0, %v1491_v19 }
  0x1b   : > { %1241 = vmatprep.subr.mxu0 %v416_v2  ;;  %v404_v15 = vld [vmem:[%s1840_s2 + $0x8] sm:$0xff]  ;;  %v403_v16 = vld [vmem:[%s1840_s2] sm:$0xff]  ;;  %508 = vst [vmem:[#allocation5 + $0x8] sm:$0xff] %v1491_v19  ;;  %509 = vst [vmem:[#allocation5] sm:$0xff] %v1491_v19 }
  0x1c   : > { %1242 = vmatpush3.msra.mxu0 %v416_v2  ;;  %v402_v17 = vld [vmem:[%s1585_s25 + $0x8] sm:$0xff]  ;;  %v1148_v20 = vld [vmem:[%s1841_s3] ss:$0 sm:$0xff] }
  0x1d   : > { %1243 = vmatprep.subr.mxu0 %v415_v3 }
  0x1e   : > { %1244 = vmatpush3.msra.mxu0 %v415_v3 }
  0x1f   : > { %1245 = vmatprep.subr.mxu0 %v414_v5 }
  0x20   : > { %1246 = vmatpush3.msra.mxu0 %v414_v5 }
  0x21   : > { %1247 = vmatprep.subr.mxu0 %v413_v6 }
  0x22   : > { %1248 = vmatpush3.msra.mxu0 %v413_v6 }
  0x23   : > { %1249 = vmatprep.subr.mxu0 %v412_v7 }
  0x24   : > { %1250 = vmatpush3.msra.mxu0 %v412_v7 }
  0x25   : > { %1251 = vmatprep.subr.mxu0 %v411_v8 }
  0x26   : > { %1252 = vmatpush3.msra.mxu0 %v411_v8 }
  0x27   : > { %1253 = vmatprep.subr.mxu0 %v410_v9 }
  0x28   : > { %1254 = vmatpush3.msra.mxu0 %v410_v9 }
  0x29   : > { %1255 = vmatprep.subr.mxu0 %v409_v10 }
  0x2a   : > { %1256 = vmatpush3.msra.mxu0 %v409_v10 }
  0x2b   : > { %1257 = vmatprep.subr.mxu0 %v408_v11 }
  0x2c   : > { %1258 = vmatpush3.msra.mxu0 %v408_v11 }
  0x2d   : > { %1259 = vmatprep.subr.mxu0 %v407_v12 }
  0x2e   : > { %1260 = vmatpush3.msra.mxu0 %v407_v12 }
  0x2f   : > { %1261 = vmatprep.subr.mxu0 %v406_v13 }
  0x30   : > { %1262 = vmatpush3.msra.mxu0 %v406_v13 }
  0x31   : > { %1263 = vmatprep.subr.mxu0 %v405_v14 }
  0x32   : > { %1264 = vmatpush3.msra.mxu0 %v405_v14 }
  0x33   : > { %1265 = vmatprep.subr.mxu0 %v404_v15 }
  0x34   : > { %1266 = vmatpush3.msra.mxu0 %v404_v15 }
  0x35   : > { %1267 = vmatprep.subr.mxu0 %v403_v16 }
  0x36   : > { %1268 = vmatpush3.msra.mxu0 %v403_v16 }
  0x37   : > { %1270 = vmatmul.mubr.f32.vlgmr.msra.gmra.mxu0 %v402_v17 }
  0xf7   : > { %v1271_v21 = vpop.f32.mrf.mxu0 }
  0xf8   : > { %v498_v22 = vadd.f32 %v1271_v21, %v1148_v20 }
  0xf9   : > { %v492_v23 = vpop.f32.mrf.mxu0 }
  0xfa   : > { %502 = vst [vmem:[#allocation2 + $0x8] sm:$0xff] %v498_v22  ;;  %v493_v24 = vadd.f32 %v1148_v20, %v492_v23 }
  0xfc   : > { %501 = vst [vmem:[#allocation2] sm:$0xff] %v493_v24 }
  0xfd PF: > { %v527_v25 = vld [vmem:[%s1842_s4 + $0x78] sm:$0xff]  ;;  %v526_v26 = vld [vmem:[%s1842_s4 + $0x70] sm:$0xff]  ;;  %v525_v27 = vld [vmem:[%s1842_s4 + $0x68] sm:$0xff]  ;;  %vm787_vm1 = vcmask 130048   ;;  %v1492_v6 = vmov 0   ;;  %vm830_vm2 = vcmask 7168  }
  0xfe   : > { %1272 = vmatprep.subr.mxu0 %v527_v25  ;;  %v524_v28 = vld [vmem:[%s1842_s4 + $0x60] sm:$0xff]  ;;  %v523_v30 = vld [vmem:[%s1842_s4 + $0x58] sm:$0xff]  ;;  %v522_v31 = vld [vmem:[%s1842_s4 + $0x50] sm:$0xff]  ;;  %1435 = vset.pattern.permute.xlu1 %v1492_v6  ;;  %p1153_p8 = scmp.ne.s32.totalorder %s1472_s13, 3 }
  0xff   : > { %1273 = vmatpush3.msra.mxu0 %v527_v25  ;;  %v510_v29 = vld [vmem:[%s1590_s29] sm:$0xff]  ;;  %v521_v32 = vld [vmem:[%s1842_s4 + $0x48] sm:$0xff]  ;;  %v519_v34 = vld [vmem:[%s1842_s4 + $0x38] sm:$0xff]  ;;  %1436 = vset.pattern.permute.xlu0 %v1492_v6 }
 0x100   : > { %1274 = vmatprep.subr.mxu0 %v526_v26  ;;  %1304 = vmatprep.mubr.f32.mxu0 %v510_v29  ;;  %v520_v33 = vld [vmem:[%s1842_s4 + $0x40] sm:$0xff]  ;;  %v518_v35 = vld [vmem:[%s1842_s4 + $0x30] sm:$0xff]  ;;  %v517_v36 = vld [vmem:[%s1842_s4 + $0x28] sm:$0xff] }
 0x101   : > { %1275 = vmatpush3.msra.mxu0 %v526_v26  ;;  %1339 = vmatprep.mubr.f32.mxu1 %v510_v29  ;;  %v516_v37 = vld [vmem:[%s1842_s4 + $0x20] sm:$0xff]  ;;  %v515_v38 = vld [vmem:[%s1842_s4 + $0x18] sm:$0xff]  ;;  %v514_v39 = vld [vmem:[%s1842_s4 + $0x10] sm:$0xff] }
 0x102   : > { %1276 = vmatprep.subr.mxu0 %v525_v27  ;;  %v513_v40 = vld [vmem:[%s1842_s4 + $0x8] sm:$0xff]  ;;  %v512_v41 = vld [vmem:[%s1842_s4] sm:$0xff]  ;;  %v625_v50 = vld [vmem:[%s1844_s6 + $0x78] sm:$0xff] }
 0x103   : > { %1277 = vmatpush3.msra.mxu0 %v525_v27  ;;  %v1701_v42 = vld [vmem:[%s1590_s29 + $0x8] sm:$0xff]  ;;  %v708_v43 = vld [vmem:[#allocation2] sm:$0xff]  ;;  %v624_v51 = vld [vmem:[%s1844_s6 + $0x70] sm:$0xff]  ;;  %1307 = vmatprep.subr.mxu1 %v625_v50 }
 0x104   : > { %1278 = vmatprep.subr.mxu0 %v524_v28  ;;  %v1149_v44 = vld [vmem:[%s1843_s5] ss:$0 sm:$0xff]  ;;  %v709_v49 = vld [vmem:[#allocation2 + $0x8] sm:$0xff]  ;;  %1308 = vmatpush3.msra.mxu1 %v625_v50  ;;  %v621_v54 = vld [vmem:[%s1844_s6 + $0x58] sm:$0xff] }
 0x105   : > { %1279 = vmatpush3.msra.mxu0 %v524_v28  ;;  %v623_v52 = vld [vmem:[%s1844_s6 + $0x68] sm:$0xff]  ;;  %1309 = vmatprep.subr.mxu1 %v624_v51  ;;  %v622_v53 = vld [vmem:[%s1844_s6 + $0x60] sm:$0xff]  ;;  %v620_v55 = vld [vmem:[%s1844_s6 + $0x50] sm:$0xff] }
 0x106   : > { %1280 = vmatprep.subr.mxu0 %v523_v30  ;;  %1310 = vmatpush3.msra.mxu1 %v624_v51  ;;  %v619_v56 = vld [vmem:[%s1844_s6 + $0x48] sm:$0xff]  ;;  %v618_v57 = vld [vmem:[%s1844_s6 + $0x40] sm:$0xff]  ;;  %v617_v58 = vld [vmem:[%s1844_s6 + $0x38] sm:$0xff] }
 0x107   : > { %1281 = vmatpush3.msra.mxu0 %v523_v30  ;;  %1311 = vmatprep.subr.mxu1 %v623_v52  ;;  %v616_v59 = vld [vmem:[%s1844_s6 + $0x30] sm:$0xff]  ;;  %v615_v60 = vld [vmem:[%s1844_s6 + $0x28] sm:$0xff]  ;;  %v614_v61 = vld [vmem:[%s1844_s6 + $0x20] sm:$0xff] }
 0x108   : > { %1282 = vmatprep.subr.mxu0 %v522_v31  ;;  %1312 = vmatpush3.msra.mxu1 %v623_v52  ;;  %v613_v62 = vld [vmem:[%s1844_s6 + $0x18] sm:$0xff]  ;;  %v612_v63 = vld [vmem:[%s1844_s6 + $0x10] sm:$0xff]  ;;  %v611_v0 = vld [vmem:[%s1844_s6 + $0x8] sm:$0xff] }
 0x109   : > { %1283 = vmatpush3.msra.mxu0 %v522_v31  ;;  %1313 = vmatprep.subr.mxu1 %v622_v53  ;;  %v610_v1 = vld [vmem:[%s1844_s6] sm:$0xff]  ;;  %v785_v7 = vld [vmem:[#allocation3] sm:$0xff]  ;;  %v786_v10 = vld [vmem:[#allocation3 + $0x8] sm:$0xff] }
 0x10a   : > { %1284 = vmatprep.subr.mxu0 %v521_v32  ;;  %1314 = vmatpush3.msra.mxu1 %v622_v53  ;;  %v1150_v16 = vld [vmem:[%s1845_s7] ss:$0 sm:$0xff] }
 0x10b   : > { %1285 = vmatpush3.msra.mxu0 %v521_v32  ;;  %1315 = vmatprep.subr.mxu1 %v621_v54 }
 0x10c   : > { %1286 = vmatprep.subr.mxu0 %v520_v33  ;;  %1316 = vmatpush3.msra.mxu1 %v621_v54 }
 0x10d   : > { %1287 = vmatpush3.msra.mxu0 %v520_v33  ;;  %1317 = vmatprep.subr.mxu1 %v620_v55 }
 0x10e   : > { %1288 = vmatprep.subr.mxu0 %v519_v34  ;;  %1318 = vmatpush3.msra.mxu1 %v620_v55 }
 0x10f   : > { %1289 = vmatpush3.msra.mxu0 %v519_v34  ;;  %1319 = vmatprep.subr.mxu1 %v619_v56  ;;  %v818_v34 = vld [vmem:[#allocation4] sm:$0xff] }
 0x110   : > { %1290 = vmatprep.subr.mxu0 %v518_v35  ;;  %1320 = vmatpush3.msra.mxu1 %v619_v56 }
 0x111   : > { %1291 = vmatpush3.msra.mxu0 %v518_v35  ;;  %1321 = vmatprep.subr.mxu1 %v618_v57 }
 0x112   : > { %1292 = vmatprep.subr.mxu0 %v517_v36  ;;  %1322 = vmatpush3.msra.mxu1 %v618_v57 }
 0x113   : > { %1293 = vmatpush3.msra.mxu0 %v517_v36  ;;  %1323 = vmatprep.subr.mxu1 %v617_v58 }
 0x114   : > { %1294 = vmatprep.subr.mxu0 %v516_v37  ;;  %1324 = vmatpush3.msra.mxu1 %v617_v58 }
 0x115   : > { %1295 = vmatpush3.msra.mxu0 %v516_v37  ;;  %1325 = vmatprep.subr.mxu1 %v616_v59  ;;  %v819_v37 = vld [vmem:[#allocation4 + $0x8] sm:$0xff] }
 0x116   : > { %1296 = vmatprep.subr.mxu0 %v515_v38  ;;  %1326 = vmatpush3.msra.mxu1 %v616_v59 }
 0x117   : > { %1297 = vmatpush3.msra.mxu0 %v515_v38  ;;  %1327 = vmatprep.subr.mxu1 %v615_v60 }
 0x118   : > { %1298 = vmatprep.subr.mxu0 %v514_v39  ;;  %1328 = vmatpush3.msra.mxu1 %v615_v60 }
 0x119   : > { %1299 = vmatpush3.msra.mxu0 %v514_v39  ;;  %1329 = vmatprep.subr.mxu1 %v614_v61 }
 0x11a   : > { %1300 = vmatprep.subr.mxu0 %v513_v40  ;;  %1330 = vmatpush3.msra.mxu1 %v614_v61 }
 0x11b   : > { %1301 = vmatpush3.msra.mxu0 %v513_v40  ;;  %1331 = vmatprep.subr.mxu1 %v613_v62 }
 0x11c   : > { %1302 = vmatprep.subr.mxu0 %v512_v41  ;;  %1332 = vmatpush3.msra.mxu1 %v613_v62 }
 0x11d   : > { %1303 = vmatpush3.msra.mxu0 %v512_v41  ;;  %1333 = vmatprep.subr.mxu1 %v612_v63 }
 0x11e   : > { %1305 = vmatmul.mubr.f32.vlgmr.msra.gmra.mxu0 %v1701_v42  ;;  %1334 = vmatpush3.msra.mxu1 %v612_v63 }
 0x11f   : > { %1346 = vmatprep.mubr.f32.mxu0 %v708_v43  ;;  %1335 = vmatprep.subr.mxu1 %v611_v0 }
 0x120   : > { %1336 = vmatpush3.msra.mxu1 %v611_v0 }
 0x121   : > { %1337 = vmatprep.subr.mxu1 %v610_v1 }
 0x122   : > { %1338 = vmatpush3.msra.mxu1 %v610_v1 }
 0x123   : > { %1340 = vmatmul.mubr.f32.vlgmr.msra.gmra.mxu1 %v1701_v42  ;;  %v834_v42 = vld [vmem:[#allocation5] sm:$0xff] }
 0x1de   : > { %v1306_v45 = vpop.f32.mrf.mxu0 }
 0x1df   : > { %v607_v46 = vadd.f32 %v1306_v45, %v1149_v44 }
 0x1e0   : > { %v601_v47 = vpop.f32.mrf.mxu0 }
 0x1e1   : > { %v602_v48 = vadd.f32 %v1149_v44, %v601_v47  ;;  %1342 = vmatprep.subr.mxu0 %v607_v46  ;;  %v833_v44 = vld [vmem:[#allocation5 + $0x8] sm:$0xff] }
 0x1e2   : > { %1343 = vmatpush3.xpose.msra.mxu0 %v607_v46 }
 0x1e3   : > { %1344 = vmatprep.subr.mxu0 %v602_v48  ;;  %v1341_v15 = vpop.f32.mrf.mxu1 }
 0x1e4   : > { %v705_v17 = vadd.f32 %v1341_v15, %v1150_v16 }
 0x1e5   : > { %v699_v18 = vpop.f32.mrf.mxu1 }
 0x1e6   : > { %1345 = vmatpush3.xpose.msra.mxu0 %v602_v48  ;;  %v700_v19 = vadd.f32 %v1150_v16, %v699_v18  ;;  %1349 = vmatprep.subr.mxu1 %v705_v17 }
 0x1e7   : > { %1350 = vmatpush3.msra.mxu1 %v705_v17 }
 0x1e8   : > { %1351 = vmatprep.subr.mxu1 %v700_v19 }
 0x1e9   : > { %1347 = vmatmul.mubr.f32.vlgmr.msra.gmra.mxu0 %v709_v49  ;;  %1352 = vmatpush3.msra.mxu1 %v700_v19 }
 0x2a9   : > { %v1348_v2 = vpop.f32.mrf.mxu0 }
 0x2aa   : > { %v791_v5 = vsel %vm787_vm1, %v1348_v2, -inf }
 0x2ab   : > { %v776_v3 = vpop.f32.mrf.mxu0 }
 0x2ac   : > { %v788_v4 = vsel %vm787_vm1, %v776_v3, -inf }
 0x2ad   : > { %789 = vmax.xlane.f32.xlu0 %v788_v4 }
 0x2b1   : > { %792 = vmax.xlane.f32.xlu0 %v791_v5 }
 0x336   : > { %v790_v8 = vpop.xlane.xlu0 %789 }
 0x337   : > { %v794_v9 = vmax.f32 %v785_v7, %v790_v8 }
 0x339   : > { %v796_v11 = vsub.f32 %v785_v7, %v794_v9  ;;  %932 = vst.msk [vmem:[#allocation3] sm:$0xff] %vm830_vm2, %v794_v9  ;;  %804 = vperm.xlu1 %1435, %v794_v9  }
 0x33a   : > { %v793_v12 = vpop.xlane.xlu0 %792 }
 0x33b   : > { %v795_v13 = vmax.f32 %v786_v10, %v793_v12  ;;  %v798_v31 = vmul.f32 1.442695, %v796_v11 }
 0x33d   : > { %v797_v14 = vsub.f32 %v786_v10, %v795_v13  ;;  %933 = vst.msk [vmem:[#allocation3 + $0x8] sm:$0xff] %vm830_vm2, %v795_v13  ;;  %809 = vperm.xlu1 %1435, %v795_v13  }
 0x33f   : > { %v800_v29 = vmul.f32 1.442695, %v797_v14 }
 0x3b4   : > { %v805_v20 = vpop.permute.xlu1 %804 }
 0x3b5   : > { %v812_v21 = vsub.f32 %v776_v3, %v805_v20 }
 0x3b7   : > { %v814_v22 = vmul.f32 1.442695, %v812_v21 }
 0x3b8   : > { %v810_v23 = vpop.permute.xlu1 %809 }
 0x3b9   : > { %1437 = vpow2.f32 %v814_v22  ;;  %v813_v24 = vsub.f32 %v1348_v2, %v810_v23 }
 0x3bb   : > { %v816_v25 = vmul.f32 1.442695, %v813_v24 }
 0x3bd   : > { %1439 = vpow2.f32 %v816_v25 }
 0x3be   : > { %1441 = vpow2.f32 %v800_v29 }
 0x3bf   : > { %1443 = vpow2.f32 %v798_v31 }
 0x3c6   : > { %v1438_v26 = vpop.eup %1437 }
 0x3c7   : > { %1353 = vmatprep.mubr.msk.f32.mxu1 %vm787_vm1, %v1438_v26  ;;  %v822_v27 = vsel %vm787_vm1, %v1438_v26, 0.0 }
 0x3c8   : > { %823 = vadd.xlane.f32.xlu0 %v822_v27 }
 0x3ca   : > { %v1440_v28 = vpop.eup %1439 }
 0x3cb   : > { %1354 = vmatmul.mubr.msk.f32.vlgmr.msra.gmra.mxu1 %vm787_vm1, %v1440_v28  ;;  %v825_v30 = vsel %vm787_vm1, %v1440_v28, 0.0  ;;  %v1442_v32 = vpop.eup %1441 }
 0x3cc   : > { %826 = vadd.xlane.f32.xlu1 %v825_v30  ;;  %v1444_v33 = vpop.eup %1443  ;;  %v821_v39 = vmul.f32 %v1442_v32, %v819_v37 }
 0x3cd   : > { %v820_v35 = vmul.f32 %v1444_v33, %v818_v34 }
 0x3dd   : > { %842 = vperm.xlu1 %1435, %v1442_v32  }
 0x3de   : > { %837 = vperm.xlu0 %1436, %v1444_v33  }
 0x451   : > { %v824_v36 = vpop.xlane.xlu0 %823 }
 0x452   : > { %v828_v38 = vadd.f32 %v824_v36, %v820_v35 }
 0x454   : > { %831 = vst.msk [vmem:[#allocation4] sm:$0xff] %vm830_vm2, %v828_v38 }
 0x455   : > { %v827_v40 = vpop.xlane.xlu1 %826 }
 0x456   : > { %v829_v41 = vadd.f32 %v827_v40, %v821_v39 }
 0x458   : > { %832 = vst.msk [vmem:[#allocation4 + $0x8] sm:$0xff] %vm830_vm2, %v829_v41 }
 0x459   : > { %v843_v43 = vpop.permute.xlu1 %842  ;;  %v838_v45 = vpop.permute.xlu0 %837 }
 0x45a   : > { %v846_v46 = vmul.f32 %v843_v43, %v834_v42  ;;  %v845_v48 = vmul.f32 %v838_v45, %v833_v44 }
 0x48b   : > { %v1355_v47 = vpop.f32.mrf.mxu1 }
 0x48c   : > { %v929_v49 = vadd.f32 %v1355_v47, %v846_v46  ;;  %937 = sbr.rel (%p1153_p8) target bundleno = 1513 (0x5e9), region = 68 }
 0x48d   : > { %v919_v50 = vpop.f32.mrf.mxu1 }
 0x48e   : > { %931 = vst [vmem:[#allocation5] sm:$0xff] %v929_v49  ;;  %v928_v51 = vadd.f32 %v919_v50, %v845_v48 }
 0x490   : > { %930 = vst [vmem:[#allocation5 + $0x8] sm:$0xff] %v928_v51 }
 0x491   : > { %v940_v52 = vld [vmem:[#allocation4] sm:$0xff]  ;;  %v971_v53 = vld [vmem:[%s1846_s8 + $0x78] sm:$0xff]  ;;  %v1493_v54 = vmov 0   ;;  %v970_v55 = vld [vmem:[%s1846_s8 + $0x70] sm:$0xff] }
 0x492   : > { %1445 = vset.pattern.permute.xlu0 %v1493_v54  ;;  %1356 = vmatprep.subr.mxu0 %v971_v53  ;;  %v969_v56 = vld [vmem:[%s1846_s8 + $0x68] sm:$0xff]  ;;  %v968_v58 = vld [vmem:[%s1846_s8 + $0x60] sm:$0xff]  ;;  %v967_v59 = vld [vmem:[%s1846_s8 + $0x58] sm:$0xff] }
 0x493   : > { %944 = vperm.xlu0 %1445, %v940_v52   ;;  %1357 = vmatpush3.msra.mxu0 %v971_v53  ;;  %v941_v57 = vld [vmem:[#allocation4 + $0x8] sm:$0xff]  ;;  %v966_v60 = vld [vmem:[%s1846_s8 + $0x50] sm:$0xff]  ;;  %v964_v62 = vld [vmem:[%s1846_s8 + $0x40] sm:$0xff] }
 0x494   : > { %1358 = vmatprep.subr.mxu0 %v970_v55  ;;  %v965_v61 = vld [vmem:[%s1846_s8 + $0x48] sm:$0xff]  ;;  %v963_v63 = vld [vmem:[%s1846_s8 + $0x38] sm:$0xff]  ;;  %v962_v0 = vld [vmem:[%s1846_s8 + $0x30] sm:$0xff] }
 0x495   : > { %1359 = vmatpush3.msra.mxu0 %v970_v55  ;;  %v961_v1 = vld [vmem:[%s1846_s8 + $0x28] sm:$0xff]  ;;  %v960_v2 = vld [vmem:[%s1846_s8 + $0x20] sm:$0xff]  ;;  %v959_v3 = vld [vmem:[%s1846_s8 + $0x18] sm:$0xff] }
 0x496   : > { %1360 = vmatprep.subr.mxu0 %v969_v56  ;;  %v958_v4 = vld [vmem:[%s1846_s8 + $0x10] sm:$0xff]  ;;  %v957_v5 = vld [vmem:[%s1846_s8 + $0x8] sm:$0xff]  ;;  %v956_v6 = vld [vmem:[%s1846_s8] sm:$0xff] }
 0x497   : > { %949 = vperm.xlu0 %1445, %v941_v57   ;;  %1361 = vmatpush3.msra.mxu0 %v969_v56  ;;  %v938_v9 = vld [vmem:[#allocation5 + $0x8] sm:$0xff]  ;;  %v939_v12 = vld [vmem:[#allocation5] sm:$0xff]  ;;  %v1154_v16 = vld [vmem:[%s1847_s9] ss:$0 sm:$0xff] }
 0x498   : > { %1362 = vmatprep.subr.mxu0 %v968_v58 }
 0x499   : > { %1363 = vmatpush3.msra.mxu0 %v968_v58 }
 0x49a   : > { %1364 = vmatprep.subr.mxu0 %v967_v59 }
 0x49b   : > { %1365 = vmatpush3.msra.mxu0 %v967_v59 }
 0x49c   : > { %1366 = vmatprep.subr.mxu0 %v966_v60 }
 0x49d   : > { %1367 = vmatpush3.msra.mxu0 %v966_v60 }
 0x49e   : > { %1368 = vmatprep.subr.mxu0 %v965_v61 }
 0x49f   : > { %1369 = vmatpush3.msra.mxu0 %v965_v61 }
 0x4a0   : > { %1370 = vmatprep.subr.mxu0 %v964_v62 }
 0x4a1   : > { %1371 = vmatpush3.msra.mxu0 %v964_v62 }
 0x4a2   : > { %1372 = vmatprep.subr.mxu0 %v963_v63 }
 0x4a3   : > { %1373 = vmatpush3.msra.mxu0 %v963_v63 }
 0x4a4   : > { %1374 = vmatprep.subr.mxu0 %v962_v0 }
 0x4a5   : > { %1375 = vmatpush3.msra.mxu0 %v962_v0 }
 0x4a6   : > { %1376 = vmatprep.subr.mxu0 %v961_v1 }
 0x4a7   : > { %1377 = vmatpush3.msra.mxu0 %v961_v1 }
 0x4a8   : > { %1378 = vmatprep.subr.mxu0 %v960_v2 }
 0x4a9   : > { %1379 = vmatpush3.msra.mxu0 %v960_v2 }
 0x4aa   : > { %1380 = vmatprep.subr.mxu0 %v959_v3 }
 0x4ab   : > { %1381 = vmatpush3.msra.mxu0 %v959_v3 }
 0x4ac   : > { %1382 = vmatprep.subr.mxu0 %v958_v4 }
 0x4ad   : > { %1383 = vmatpush3.msra.mxu0 %v958_v4 }
 0x4ae   : > { %1384 = vmatprep.subr.mxu0 %v957_v5 }
 0x4af   : > { %1385 = vmatpush3.msra.mxu0 %v957_v5 }
 0x4b0   : > { %1386 = vmatprep.subr.mxu0 %v956_v6 }
 0x4b1   : > { %1387 = vmatpush3.msra.mxu0 %v956_v6 }
 0x50e   : > { %v945_v7 = vpop.permute.xlu0 %944 }
 0x50f   : > { %1446 = vrcp.f32 %v945_v7 }
 0x512   : > { %v950_v8 = vpop.permute.xlu0 %949 }
 0x513   : > { %1448 = vrcp.f32 %v950_v8 }
 0x51c   : > { %v1447_v10 = vpop.eup %1446 }
 0x51d   : > { %v953_v11 = vmul.f32 %v1447_v10, %v938_v9 }
 0x51f   : > { %1388 = vmatprep.mubr.f32.mxu0 %v953_v11 }
 0x520   : > { %v1449_v13 = vpop.eup %1448 }
 0x521   : > { %v955_v14 = vmul.f32 %v1449_v13, %v939_v12 }
 0x523   : > { %1389 = vmatmul.mubr.f32.vlgmr.msra.gmra.mxu0 %v955_v14 }
 0x5e3   : > { %v1390_v15 = vpop.f32.mrf.mxu0 }
 0x5e4   : > { %v1051_v19 = vadd.f32 %v1390_v15, %v1154_v16 }
 0x5e5   : > { %v1045_v17 = vpop.f32.mrf.mxu0 }
 0x5e6   : > { %v1046_v18 = vadd.f32 %v1154_v16, %v1045_v17  ;;  %1055 = vst [vmem:[%s1595_s12 + $0x8] sm:$0xff] %v1051_v19 }
 0x5e8   : > { %1054 = vst [vmem:[%s1595_s12] sm:$0xff] %v1046_v18 }
 0x5e9 PF: > { %s20_s17 = sadd.s32 1, %s1488_s17   ;;  %s1849_s13 = smov %s1480_s15 }
 0x5ea   : > { %p17_p9 = scmp.ge.s32.totalorder %s20_s17, 18   ;;  %s1850_s14 = smov %s1484_s16 }
 0x5eb   : > { %s1851_s15 = smov %s1854_s18  ;;  %s1852_s16 = smov %s1858_s19 }
 0x5ec   :  { %19 = sbr.rel (!%p17_p9) target bundleno = 3 (0x3), region = 101 }

</bundles_post_ra>
